<compile_context>
chip_gen: v6e
topology: v6e:2x2x1
jax: 0.10.0
libtpu: 0.0.40
codegen_flags: <defaults>
</compile_context>

<pallas_src>
import jax
import jax.numpy as jnp
import numpy as np
from jax import lax
from jax.experimental import pallas as pl
from jax.experimental.pallas import tpu as pltpu


def _round_up(x, m):
    return (x + m - 1) // m * m


def _sublane_min(dtype):
    # f32 -> 8, bf16/f16 -> 16, int8/fp8 -> 32 (packed-sublane minimum).
    return max(8, 32 // np.dtype(dtype).itemsize)


def _decoder2_kernel(zl_ref, zd_ref, out_ref, acc_ref):
    # zl_ref: (tm, tk), zd_ref: (tn, tk), out_ref: (tm, tn), acc_ref: (tm, tn) f32
    k = pl.program_id(2)

    @pl.when(k == 0)
    def _init():
        acc_ref[...] = jnp.zeros_like(acc_ref)

    # A @ B^T: contract both operands on their last (D) axis -> MXU path with
    # no XLU transpose of the (tn, tk) disease tile.
    acc_ref[...] += lax.dot_general(
        zl_ref[...],
        zd_ref[...],
        dimension_numbers=(((1,), (1,)), ((), ())),
        preferred_element_type=jnp.float32,
    )

    @pl.when(k == pl.num_programs(2) - 1)
    def _finalize():
        s = acc_ref[...]
        # sigmoid(s) = 0.5 * (tanh(s/2) + 1): one EUP op, exact (no approx recip).
        out_ref[...] = (0.5 * (jnp.tanh(0.5 * s) + 1.0)).astype(out_ref.dtype)


def decoder2_forward(z_lncRNA, z_disease, *, tm=512, tn=1024,
                     compute_dtype=None, out_dtype=None):
    """sigmoid(z_lncRNA @ z_disease.T) as a tiled Pallas TPU kernel.

    compute_dtype: optionally cast matmul operands (e.g. jnp.bfloat16 -> halves
      input DMA; native on v5e/v6e/v7x MXUs); accumulation is always float32.
    out_dtype: output dtype; defaults to the input dtype to match the PyTorch
      module. Pass jnp.bfloat16 to halve the (store-bound) output stream.
    """
    M, D = z_lncRNA.shape
    N, D2 = z_disease.shape
    if D != D2:
        raise ValueError("latent dims must match")

    out_dtype = z_lncRNA.dtype if out_dtype is None else out_dtype
    in_dtype = z_lncRNA.dtype if compute_dtype is None else compute_dtype

    in_bytes = np.dtype(in_dtype).itemsize
    out_bytes = np.dtype(out_dtype).itemsize

    # Sublane-packing minimum shared by the lhs tile rows and the output tile rows.
    sub_min = max(_sublane_min(out_dtype), _sublane_min(in_dtype))

    # Pad only to hardware minimums (sublanes / 128 lanes), never to tile size.
    Mp = _round_up(M, sub_min)
    Np = _round_up(N, 128)

    # K (latent) axis: un-tiled for typical small D; tile at 512 for large D so
    # the VMEM footprint stays bounded regardless of embedding width.
    if D <= 1024:
        tk, Dp = D, D
    else:
        tk = 512
        Dp = _round_up(D, tk)
    gk = Dp // tk

    # Big lane-dense tiles (fewer grid steps, unmasked stores), clamped to the
    # minimally-padded problem; tm multiple of sub_min, tn multiple of 128.
    tm = max(sub_min, min(_round_up(tm, sub_min), Mp))
    tn = max(128, min(_round_up(tn, 128), Np))

    zl = z_lncRNA if compute_dtype is None else z_lncRNA.astype(in_dtype)
    zd = z_disease if compute_dtype is None else z_disease.astype(in_dtype)
    if Mp != M or Dp != D:
        zl = jnp.pad(zl, ((0, Mp - M), (0, Dp - D)))
    if Np != N or Dp != D:
        zd = jnp.pad(zd, ((0, Np - N), (0, Dp - D)))

    gi = pl.cdiv(Mp, tm)
    gj = pl.cdiv(Np, tn)

    # Put the parallel axis with more tiles first so both v7x TensorCores get
    # work (harmless on single-core v5e/v6e). The operand whose block index is
    # constant along the inner axis stays resident and is not re-DMA'd.
    swap = gj > gi
    if swap:
        grid = (gj, gi, gk)
        zl_spec = pl.BlockSpec((tm, tk), lambda j, i, k: (i, k))
        zd_spec = pl.BlockSpec((tn, tk), lambda j, i, k: (j, k))
        out_spec = pl.BlockSpec((tm, tn), lambda j, i, k: (i, j))
    else:
        grid = (gi, gj, gk)
        zl_spec = pl.BlockSpec((tm, tk), lambda i, j, k: (i, k))
        zd_spec = pl.BlockSpec((tn, tk), lambda i, j, k: (j, k))
        out_spec = pl.BlockSpec((tm, tn), lambda i, j, k: (i, j))

    # Realistic HBM traffic: the operand tracking the *inner* grid axis is
    # re-fetched once per outer tile; with a K axis both are re-fetched.
    if gk == 1:
        lhs_passes, rhs_passes = (gj, 1) if swap else (1, gi)
    else:
        lhs_passes, rhs_passes = gj, gi
    cost = pl.CostEstimate(
        flops=2 * Mp * Np * Dp,
        transcendentals=Mp * Np,
        bytes_accessed=in_bytes * (Mp * Dp * lhs_passes + Np * Dp * rhs_passes)
        + out_bytes * Mp * Np,
    )

    # Double-buffered inputs/outputs + f32 accumulator; request real footprint
    # plus headroom, capped well under v7x's 64 MiB physical VMEM.
    vmem_fp = (2 * (tm + tn) * tk * in_bytes
               + 2 * tm * tn * out_bytes
               + tm * tn * 4)
    vmem_limit = int(min(48 * 1024 * 1024,
                         max(vmem_fp + 8 * 1024 * 1024, 16 * 1024 * 1024)))

    out = pl.pallas_call(
        _decoder2_kernel,
        out_shape=jax.ShapeDtypeStruct((Mp, Np), out_dtype),
        grid_spec=pltpu.PrefetchScalarGridSpec(
            num_scalar_prefetch=0,
            grid=grid,
            in_specs=[zl_spec, zd_spec],
            out_specs=out_spec,
            scratch_shapes=[pltpu.VMEM((tm, tn), jnp.float32)],
        ),
        compiler_params=pltpu.CompilerParams(
            dimension_semantics=("parallel", "parallel", "arbitrary"),
            vmem_limit_bytes=vmem_limit,
        ),
        cost_estimate=cost,
    )(zl, zd)

    if Mp != M or Np != N:
        out = out[:M, :N]
    return out


if __name__ == "__main__":
    # Deterministic small inputs: 8 lncRNAs, 16 diseases, hidden=32.
    key = jax.random.PRNGKey(0)
    k1, k2 = jax.random.split(key)
    M, N, D = 8, 16, 32
    z_lncRNA = jax.random.normal(k1, (M, D), dtype=jnp.float32)
    z_disease = jax.random.normal(k2, (N, D), dtype=jnp.float32)

    ref = jax.nn.sigmoid(z_lncRNA @ z_disease.T)

    # Default path: f32 operands, f32 output (matches PyTorch module semantics).
    out = jax.block_until_ready(decoder2_forward(z_lncRNA, z_disease))
    assert out.shape == (M, N)
    assert out.dtype == ref.dtype
    # Tolerance covers MXU multi-pass f32 matmul precision on real hardware.
    assert jnp.allclose(out, ref, atol=1e-2, rtol=0), \
        float(jnp.max(jnp.abs(out - ref)))

    # bf16-operand fast path (halves input DMA; recommended on v5e/v6e/v7x).
    out_bf16_in = jax.block_until_ready(
        decoder2_forward(z_lncRNA, z_disease, compute_dtype=jnp.bfloat16))
    assert jnp.allclose(out_bf16_in, ref, atol=3e-2, rtol=0)

    # bf16 output path (halves the store-bound output stream).
    out_bf16_out = jax.block_until_ready(
        decoder2_forward(z_lncRNA, z_disease,
                         compute_dtype=jnp.bfloat16, out_dtype=jnp.bfloat16))
    assert out_bf16_out.dtype == jnp.bfloat16
    assert jnp.allclose(out_bf16_out.astype(jnp.float32), ref, atol=5e-2, rtol=0)

    print("KERNEL_OK")
</pallas_src>

<mosaic_0001>
module attributes {stable_mosaic.version = 11 : i64} {
  func.func @_decoder2_kernel(%arg0: i32, %arg1: i32, %arg2: i32, %arg3: memref<8x32xf32, #tpu.memory_space<vmem>>, %arg4: memref<128x32xf32, #tpu.memory_space<vmem>>, %arg5: memref<8x128xf32, #tpu.memory_space<vmem>>, %arg6: memref<8x128xf32, #tpu.memory_space<vmem>>) attributes {dimension_semantics = [#tpu.dimension_semantics<parallel>, #tpu.dimension_semantics<parallel>, #tpu.dimension_semantics<arbitrary>], iteration_bounds = array<i64: 1, 1, 1>, scalar_prefetch = 0 : i64, scratch_operands = 1 : i64, tpu.core_type = #tpu.core_type<tc>, window_params = [{transform_indices = @transform_0, window_bounds = array<i64: 8, 32>}, {transform_indices = @transform_1, window_bounds = array<i64: 128, 32>}, {transform_indices = @transform_2, window_bounds = array<i64: 8, 128>}]} {
    %c0_i32 = arith.constant 0 : i32
    %0 = arith.cmpi eq, %arg2, %c0_i32 : i32
    %1 = arith.extui %0 : i1 to i32
    %c0_i32_0 = arith.constant 0 : i32
    %2 = arith.cmpi ne, %1, %c0_i32_0 : i32
    scf.if %2 {
      %cst_10 = arith.constant 0.000000e+00 : f32
      %12 = vector.broadcast %cst_10 : f32 to vector<8x128xf32>
      %c0_11 = arith.constant 0 : index
      %c0_12 = arith.constant 0 : index
      %13 = vector.load %arg6[%c0_11, %c0_12] : memref<8x128xf32, #tpu.memory_space<vmem>>, vector<8x128xf32>
      tpu.vector_store %arg6[%c0_11, %c0_12], %12 {strides = array<i32>} : memref<8x128xf32, #tpu.memory_space<vmem>>, vector<8x128xf32>,
    } else {
    }
    %c0 = arith.constant 0 : index
    %c0_1 = arith.constant 0 : index
    %3 = vector.load %arg6[%c0, %c0_1] : memref<8x128xf32, #tpu.memory_space<vmem>>, vector<8x128xf32>
    %c0_2 = arith.constant 0 : index
    %c0_3 = arith.constant 0 : index
    %4 = vector.load %arg3[%c0_2, %c0_3] : memref<8x32xf32, #tpu.memory_space<vmem>>, vector<8x32xf32>
    %c0_4 = arith.constant 0 : index
    %c0_5 = arith.constant 0 : index
    %5 = vector.load %arg4[%c0_4, %c0_5] : memref<128x32xf32, #tpu.memory_space<vmem>>, vector<128x32xf32>
    %cst = arith.constant dense<0.000000e+00> : vector<8x128xf32>
    %6 = tpu.matmul %4, %5, %cst {dimension_numbers = #tpu.dot_dimension_numbers<[1], [1], [0], [0], [0, 0, 1, 0], [], []>} : vector<8x32xf32>, vector<128x32xf32>, vector<8x128xf32> -> vector<8x128xf32>
    %7 = arith.addf %3, %6 : vector<8x128xf32>
    %c0_6 = arith.constant 0 : index
    %c0_7 = arith.constant 0 : index
    %8 = vector.load %arg6[%c0_6, %c0_7] : memref<8x128xf32, #tpu.memory_space<vmem>>, vector<8x128xf32>
    tpu.vector_store %arg6[%c0_6, %c0_7], %7 {strides = array<i32>} : memref<8x128xf32, #tpu.memory_space<vmem>>, vector<8x128xf32>,
    %c0_i32_8 = arith.constant 0 : i32
    %9 = arith.cmpi eq, %arg2, %c0_i32_8 : i32
    %10 = arith.extui %9 : i1 to i32
    %c0_i32_9 = arith.constant 0 : i32
    %11 = arith.cmpi ne, %10, %c0_i32_9 : i32
    scf.if %11 {
      %c0_10 = arith.constant 0 : index
      %c0_11 = arith.constant 0 : index
      %12 = vector.load %arg6[%c0_10, %c0_11] : memref<8x128xf32, #tpu.memory_space<vmem>>, vector<8x128xf32>
      %cst_12 = arith.constant 5.000000e-01 : f32
      %13 = vector.broadcast %cst_12 : f32 to vector<8x128xf32>
      %14 = arith.mulf %13, %12 : vector<8x128xf32>
      %15 = math.tanh %14 : vector<8x128xf32>
      %cst_13 = arith.constant 1.000000e+00 : f32
      %16 = vector.broadcast %cst_13 : f32 to vector<8x128xf32>
      %17 = arith.addf %15, %16 : vector<8x128xf32>
      %cst_14 = arith.constant 5.000000e-01 : f32
      %18 = vector.broadcast %cst_14 : f32 to vector<8x128xf32>
      %19 = arith.mulf %18, %17 : vector<8x128xf32>
      %c0_15 = arith.constant 0 : index
      %c0_16 = arith.constant 0 : index
      %20 = vector.load %arg5[%c0_15, %c0_16] : memref<8x128xf32, #tpu.memory_space<vmem>>, vector<8x128xf32>
      tpu.vector_store %arg5[%c0_15, %c0_16], %19 {strides = array<i32>} : memref<8x128xf32, #tpu.memory_space<vmem>>, vector<8x128xf32>,
    } else {
    }
    return
  }
  func.func @transform_0(%arg0: i32, %arg1: i32, %arg2: i32) -> (i32, i32) {
    %c0_i32 = arith.constant 0 : i32
    return %arg0, %arg2 : i32, i32
  }
  func.func @transform_1(%arg0: i32, %arg1: i32, %arg2: i32) -> (i32, i32) {
    %c0_i32 = arith.constant 0 : i32
    return %arg1, %arg2 : i32, i32
  }
  func.func @transform_2(%arg0: i32, %arg1: i32, %arg2: i32) -> (i32, i32) {
    %c0_i32 = arith.constant 0 : i32
    return %arg0, %arg1 : i32, i32
  }
}

</mosaic_0001>

<bundles_post_ra>
// kernel: tpu_custom_call.1
= control target key start
LH: loop header
LB: loop body
LE: loop exit
PB: predicated region body
PF: predicated region fallthrough
CT: control target
= control target key end

     0   :  { %vm35_vm0 = vcmask 261120   ;;  %v278_v1 = vmov 0.0   ;;  %vm279_vm1 = vmmov 0   ;;  %s367_s0 = inlined_call_operand.vmem [shape: f32[8,32], index: 0, kind: input, shape index: {}]   ;;  %s368_s1 = inlined_call_operand.vmem [shape: f32[128,32], index: 1, kind: input, shape index: {}]   ;;  %s369_s2 = inlined_call_operand.hbm [shape: f32[8,128], index: 2, kind: output, shape index: {}]  }
   0x1   :  { %v34_v0 = vld [vmem:[%s368_s1 + $0x78] sm:$0xff]  ;;  %216 = vmatprep.subr.mxu0 %v278_v1  ;;  %248 = vmatprep.mubr.msk.f32.mxu0 %vm279_vm1, %v278_v1  ;;  %v33_v2 = vld [vmem:[%s368_s1 + $0x70] sm:$0xff] }
   0x2   :  { %217 = vmatpush3.xpose.msk.msra.mxu0 %vm35_vm0, %v34_v0 }
   0x3   :  { %218 = vmatprep.subr.mxu0 %v278_v1 }
   0x4   :  { %7 = vsyncpa [#allocation4], 0  ;;  %v32_v3 = vld [vmem:[%s368_s1 + $0x68] sm:$0xff]  ;;  %v31_v4 = vld [vmem:[%s368_s1 + $0x60] sm:$0xff]  ;;  %s280_s15 = smov [#allocation3]  }
   0x5   :  { %v30_v5 = vld [vmem:[%s368_s1 + $0x58] sm:$0xff]  ;;  %v29_v6 = vld [vmem:[%s368_s1 + $0x50] sm:$0xff]  ;;  %v28_v7 = vld [vmem:[%s368_s1 + $0x48] sm:$0xff]  ;;  %s174_s16 = sshll.u32 %s280_s15, 4  ;;  %s175_s16 = int_to_ptr.vmem [resolvable:$true] %s174_s16 }
   0x6   :  { %219 = vmatpush3.xpose.msk.msra.mxu0 %vm35_vm0, %v33_v2  ;;  %v27_v8 = vld [vmem:[%s368_s1 + $0x40] sm:$0xff]  ;;  %v26_v9 = vld [vmem:[%s368_s1 + $0x38] sm:$0xff]  ;;  %v25_v10 = vld [vmem:[%s368_s1 + $0x30] sm:$0xff]  ;;  %p261_p1 = scmp.lt.s32.totalorder %s175_s16, %s175_s16 }
   0x7   :  { %220 = vmatprep.subr.mxu0 %v278_v1  ;;  %v24_v11 = vld [vmem:[%s368_s1 + $0x28] sm:$0xff]  ;;  %v23_v12 = vld [vmem:[%s368_s1 + $0x20] sm:$0xff]  ;;  %v22_v13 = vld [vmem:[%s368_s1 + $0x18] sm:$0xff] }
   0x8   :  { %v21_v14 = vld [vmem:[%s368_s1 + $0x10] sm:$0xff]  ;;  %v20_v15 = vld [vmem:[%s368_s1 + $0x8] sm:$0xff]  ;;  %v19_v16 = vld [vmem:[%s368_s1] sm:$0xff]  ;;  %s256_s1 = scalar_lea.vmem %s175_s16, 128 }
   0x9   :  { %v18_v17 = vld [vmem:[%s367_s0] sm:$0xff]  ;;  %p257_p0 = scmp.ne.s32.totalorder %s175_s16, %s256_s1  ;;  %p262_p2 = scmp.lt.s32.totalorder %s256_s1, %s256_s1 }
   0xa   :  { %221 = vmatpush3.xpose.msk.msra.mxu0 %vm35_vm0, %v32_v3 }
   0xb   :  { %222 = vmatprep.subr.mxu0 %v278_v1  ;;  %p263_p3 = por %p262_p2, %p261_p1 }
   0xd   :  { %p264_p4 = pnand %p263_p3, %p257_p0 }
   0xe   :  { %223 = vmatpush3.xpose.msk.msra.mxu0 %vm35_vm0, %v31_v4 }
   0xf   :  { %224 = vmatprep.subr.mxu0 %v278_v1 }
  0x12   :  { %225 = vmatpush3.xpose.msk.msra.mxu0 %vm35_vm0, %v30_v5 }
  0x13   :  { %226 = vmatprep.subr.mxu0 %v278_v1 }
  0x16   :  { %227 = vmatpush3.xpose.msk.msra.mxu0 %vm35_vm0, %v29_v6 }
  0x17   :  { %228 = vmatprep.subr.mxu0 %v278_v1 }
  0x1a   :  { %229 = vmatpush3.xpose.msk.msra.mxu0 %vm35_vm0, %v28_v7 }
  0x1b   :  { %230 = vmatprep.subr.mxu0 %v278_v1 }
  0x1e   :  { %231 = vmatpush3.xpose.msk.msra.mxu0 %vm35_vm0, %v27_v8 }
  0x1f   :  { %232 = vmatprep.subr.mxu0 %v278_v1 }
  0x22   :  { %233 = vmatpush3.xpose.msk.msra.mxu0 %vm35_vm0, %v26_v9 }
  0x23   :  { %234 = vmatprep.subr.mxu0 %v278_v1 }
  0x26   :  { %235 = vmatpush3.xpose.msk.msra.mxu0 %vm35_vm0, %v25_v10 }
  0x27   :  { %236 = vmatprep.subr.mxu0 %v278_v1 }
  0x2a   :  { %237 = vmatpush3.xpose.msk.msra.mxu0 %vm35_vm0, %v24_v11 }
  0x2b   :  { %238 = vmatprep.subr.mxu0 %v278_v1 }
  0x2e   :  { %239 = vmatpush3.xpose.msk.msra.mxu0 %vm35_vm0, %v23_v12 }
  0x2f   :  { %240 = vmatprep.subr.mxu0 %v278_v1 }
  0x32   :  { %241 = vmatpush3.xpose.msk.msra.mxu0 %vm35_vm0, %v22_v13 }
  0x33   :  { %242 = vmatprep.subr.mxu0 %v278_v1 }
  0x36   :  { %243 = vmatpush3.xpose.msk.msra.mxu0 %vm35_vm0, %v21_v14 }
  0x37   :  { %244 = vmatprep.subr.mxu0 %v278_v1 }
  0x3a   :  { %245 = vmatpush3.xpose.msk.msra.mxu0 %vm35_vm0, %v20_v15 }
  0x3b   :  { %246 = vmatprep.subr.mxu0 %v278_v1 }
  0x3e   :  { %247 = vmatpush3.xpose.msk.msra.mxu0 %vm35_vm0, %v19_v16 }
  0x41   :  { %249 = vmatmul.mubr.msk.f32.vlgmr.msra.gmra.mxu0 %vm35_vm0, %v18_v17 }
 0x101   :  { %v153_v18 = vpop.f32.mrf.mxu0 }
 0x102   :  { %v163_v19 = vmul.f32 0.5, %v153_v18 }
 0x103   :  { %v250_v20 = vpop.f32.mrf.mxu0 }
 0x104   :  { %254 = vtanh.f32 %v163_v19 }
 0x111   :  { %v255_v21 = vpop.eup %254 }
 0x112   :  { %v165_v22 = vadd.f32 1.0, %v255_v21 }
 0x114   :  { %v166_v23 = vmul.f32 0.5, %v165_v22 }
 0x116   :  { %167 = vst [vmem:[#allocation3] sm:$0xff] %v166_v23 }
 0x117   :  { %267 = shalt.err (!%p264_p4)
}
 0x118   :  { %177 = dma.vmem_to_hbm [thread:$0]  %s175_s16, 128, %s369_s2, [#allocation4]  }
 0x119   :  { %276 = dma.done.wait [#allocation4], 128  }
 0x11a   :  { %277 = vsyncadd [#allocation4], 4294967168 }
 0x11b   :  { %181 = vsyncpa [#allocation4], 1 }

</bundles_post_ra>
